<compile_context>
chip_gen: v6e
topology: v6e:2x2x1
jax: 0.10.0
libtpu: 0.0.40
codegen_flags: <defaults>
</compile_context>

<pallas_src>
import jax
import jax.numpy as jnp
from jax.experimental import pallas as pl
from jax.experimental.pallas import tpu as pltpu


def _round_up(v, m):
    return ((v + m - 1) // m) * m


def _round_down(v, m):
    return (v // m) * m


def _choose_tiles(B, S, F, max_tile_bytes):
    """Pick (TB, TS): batch / step tile sizes for the streamed x slab.

    Constraints (x block is (TB, TS, F), output block is (TB, F)):
      * TB must be a multiple of 8 OR equal to B.
      * TS must be a multiple of 8 OR equal to S.
    """
    itemsize = 4
    row_bytes = S * F * itemsize
    tb_min = B if B < 8 else 8

    # Long-sequence path: even a minimal batch tile of full-S rows blows the
    # budget -> tile the step axis too (reduction handled with accumulators).
    if tb_min * row_bytes > max_tile_bytes:
        TB = tb_min
        ts = max_tile_bytes // max(TB * F * itemsize, 1)
        TS = min(max(8, _round_down(ts, 8)), S)
        return TB, TS

    TS = S
    # Keep the (TB, F) output block / f32 accumulators modest (<= ~4 MiB).
    tb_out_cap = max(8, (4 << 20) // max(F * itemsize, 1))
    tb_cap = min(max_tile_bytes // row_bytes, tb_out_cap)

    total_bytes = B * row_bytes
    if B <= tb_cap and (B < 8 or total_bytes <= (1 << 20)):
        # Tiny input: a single block, no pipeline prologue/epilogue overhead.
        return B, TS

    # Streaming regime (B >= 8 here): TB is a multiple of 8; target >= 4 batch
    # blocks (>= 2 per TensorCore on v7x) for DMA/compute overlap + megacore.
    tb = min(_round_down(tb_cap, 8), _round_up(pl.cdiv(B, 4), 8))
    tb = max(8, tb)
    if tb >= B:
        tb = B
    return tb, TS


def _make_kernel(S, TS, TB, F, n_s):
    """Build the kernel (and its scratch shapes) for the chosen tiling."""
    s_mask_needed = (n_s > 1) and (S % TS != 0)

    def _attn_weights(x, w_ref, b_ref, si):
        # Projection on the VPU: broadcast-multiply + lane reduce over F.
        # eij stays lane-dense (TB, TS) -> full-width tanh/exp on the EUP.
        w = w_ref[...]                               # (1, F) lane-major row
        bias = b_ref[0, 0]                           # scalar from SMEM
        eij = jnp.sum(x * w[:, None, :], axis=-1)    # (TB, TS)
        a = jnp.exp(jnp.tanh(eij + bias))            # tanh bounds eij: no max-sub
        if s_mask_needed:
            pos = si * TS + jax.lax.broadcasted_iota(jnp.int32, a.shape, 1)
            a = jnp.where(pos < S, a, 0.0)           # zero step-padding weights
        return a

    if n_s == 1:
        # Whole sequence resident in one block: single-pass, no accumulators.
        def kernel(x_ref, w_ref, b_ref, o_ref):
            x = x_ref[...]                           # (TB, S, F)
            a = _attn_weights(x, w_ref, b_ref, 0)    # (TB, S)
            denom = jnp.sum(a, axis=-1, keepdims=True)
            a = a / denom + 1e-10                    # same op order as torch
            o_ref[...] = jnp.sum(x * a[:, :, None], axis=1).astype(o_ref.dtype)

        return kernel, []

    # Step-tiled variant: exact accumulator decomposition
    #   out = num / den + 1e-10 * xsum
    # with num = sum_s x*a, den = sum_s a, xsum = sum_s x.
    def kernel(x_ref, w_ref, b_ref, o_ref, num_acc, den_acc, xsum_acc):
        si = pl.program_id(1)

        @pl.when(si == 0)
        def _():
            num_acc[...] = jnp.zeros_like(num_acc)
            den_acc[...] = jnp.zeros_like(den_acc)
            xsum_acc[...] = jnp.zeros_like(xsum_acc)

        x = x_ref[...]                               # (TB, TS, F)
        if s_mask_needed:
            pos = si * TS + jax.lax.broadcasted_iota(jnp.int32, (TB, TS), 1)
            # Zero padded step positions (also kills any NaN garbage reads).
            x = jnp.where((pos < S)[:, :, None], x, 0.0)

        a = _attn_weights(x, w_ref, b_ref, si)       # (TB, TS), padded -> 0
        num_acc[...] += jnp.sum(x * a[:, :, None], axis=1)
        den_acc[...] += jnp.sum(a, axis=-1, keepdims=True)
        xsum_acc[...] += jnp.sum(x, axis=1)

        @pl.when(si == pl.num_programs(1) - 1)
        def _():
            o_ref[...] = (num_acc[...] / den_acc[...]
                          + 1e-10 * xsum_acc[...]).astype(o_ref.dtype)

    scratch = [
        pltpu.VMEM((TB, F), jnp.float32),   # num
        pltpu.VMEM((TB, 1), jnp.float32),   # den
        pltpu.VMEM((TB, F), jnp.float32),   # xsum
    ]
    return kernel, scratch


def attention_forward(x, weight, bias, *, max_tile_bytes=8 << 20):
    """x: (B, S, F) f32, weight: (F, 1) f32, bias: () f32 -> (B, F) f32."""
    B, S, F = x.shape
    x = x.astype(jnp.float32)
    w_row = weight.astype(jnp.float32).reshape(1, F)       # lane-major weight
    b2d = jnp.asarray(bias, jnp.float32).reshape(1, 1)     # SMEM scalar

    TB, TS = _choose_tiles(B, S, F, max_tile_bytes)
    nb = pl.cdiv(B, TB)
    ns = pl.cdiv(S, TS)

    kernel, scratch_shapes = _make_kernel(S=S, TS=TS, TB=TB, F=F, n_s=ns)

    return pl.pallas_call(
        kernel,
        out_shape=jax.ShapeDtypeStruct((B, F), jnp.float32),
        grid_spec=pltpu.PrefetchScalarGridSpec(
            num_scalar_prefetch=0,
            grid=(nb, ns),
            in_specs=[
                pl.BlockSpec((TB, TS, F), lambda b, s: (b, s, 0)),   # x slab
                pl.BlockSpec((1, F), lambda b, s: (0, 0)),           # weight
                pl.BlockSpec(memory_space=pltpu.MemorySpace.SMEM),   # bias
            ],
            out_specs=pl.BlockSpec((TB, F), lambda b, s: (b, 0)),    # lane-dense
            scratch_shapes=scratch_shapes,
        ),
        compiler_params=pltpu.CompilerParams(
            dimension_semantics=("parallel", "arbitrary"),
            vmem_limit_bytes=48 << 20,   # headroom under v7x's 64 MiB VMEM
        ),
    )(x, w_row, b2d)


def attention_reference(x, weight, bias):
    B, S, F = x.shape
    eij = jnp.tanh((x.reshape(-1, F) @ weight).reshape(B, S) + bias)
    a = jnp.exp(eij)
    a = a / jnp.sum(a, axis=1, keepdims=True) + 1e-10
    return jnp.sum(x * a[..., None], axis=1)


if __name__ == "__main__":
    key = jax.random.PRNGKey(0)

    def make_inputs(k, B, S, F, bias_val=0.0):
        kx, kw = jax.random.split(k)
        x = jax.random.normal(kx, (B, S, F), dtype=jnp.float32)
        bound = (6.0 / (F + 1)) ** 0.5            # xavier_uniform_ for (F, 1)
        weight = jax.random.uniform(kw, (F, 1), jnp.float32, -bound, bound)
        bias = jnp.asarray(bias_val, jnp.float32)
        return x, weight, bias

    # Primary shapes implied by the module: batch=2, step_dim=8, feature_dim=32.
    B, S, F = 2, 8, 32
    x, w, b = make_inputs(key, B, S, F, bias_val=0.0)   # nn.Parameter(zeros(1))
    out = jax.block_until_ready(attention_forward(x, w, b))
    ref = attention_reference(x, w, b)
    assert out.shape == (B, F)
    assert jnp.allclose(out, ref, atol=1e-5, rtol=1e-5), "mismatch vs reference"

    # Exercise the tiled / edge-block paths with tiny forced tile budgets:
    #   (20, 8)  -> batch edge block (20 = 8+8+4), single-pass kernel
    #   (4, 20)  -> step tiling with S edge (20 = 8+8+4), accumulator kernel
    #   (20, 20) -> both edges + accumulation across S tiles
    for (B2, S2, F2, mtb) in [(20, 8, 32, 8 * 1024),
                              (4, 20, 32, 4 * 1024),
                              (20, 20, 32, 4 * 1024)]:
        k2 = jax.random.fold_in(key, B2 * 1000 + S2)
        x2, w2, b2 = make_inputs(k2, B2, S2, F2, bias_val=0.3)
        o2 = jax.block_until_ready(
            attention_forward(x2, w2, b2, max_tile_bytes=mtb))
        r2 = attention_reference(x2, w2, b2)
        assert o2.shape == (B2, F2)
        assert jnp.allclose(o2, r2, atol=1e-5, rtol=1e-5), (B2, S2, F2)

    print("KERNEL_OK")
</pallas_src>

<mosaic_0001>
module attributes {stable_mosaic.version = 11 : i64} {
  func.func @kernel(%arg0: i32, %arg1: i32, %arg2: memref<2x8x32xf32, #tpu.memory_space<vmem>>, %arg3: memref<1x32xf32, #tpu.memory_space<vmem>>, %arg4: memref<1x1xf32, #tpu.memory_space<smem>>, %arg5: memref<2x32xf32, #tpu.memory_space<vmem>>) attributes {dimension_semantics = [#tpu.dimension_semantics<parallel>, #tpu.dimension_semantics<arbitrary>], iteration_bounds = array<i64: 1, 1>, scalar_prefetch = 0 : i64, scratch_operands = 0 : i64, tpu.core_type = #tpu.core_type<tc>, window_params = [{transform_indices = @transform_0, window_bounds = array<i64: 2, 8, 32>}, {pipeline_mode = #tpu.pipeline_mode<synchronous>, transform_indices = @transform_1, window_bounds = array<i64: 1, 32>}, {transform_indices = @transform_2, window_bounds = array<i64: 1, 1>}, {transform_indices = @transform_3, window_bounds = array<i64: 2, 32>}]} {
    %c0 = arith.constant 0 : index
    %c0_0 = arith.constant 0 : index
    %c0_1 = arith.constant 0 : index
    %0 = vector.load %arg2[%c0, %c0_0, %c0_1] : memref<2x8x32xf32, #tpu.memory_space<vmem>>, vector<2x8x32xf32>
    %c0_2 = arith.constant 0 : index
    %c0_3 = arith.constant 0 : index
    %1 = vector.load %arg3[%c0_2, %c0_3] : memref<1x32xf32, #tpu.memory_space<vmem>>, vector<1x32xf32>
    %c0_4 = arith.constant 0 : index
    %c0_5 = arith.constant 0 : index
    %2 = memref.load %arg4[%c0_4, %c0_5] : memref<1x1xf32, #tpu.memory_space<smem>>
    %3 = vector.shape_cast %1 : vector<1x32xf32> to vector<1x1x32xf32>
    %4 = vector.broadcast %3 : vector<1x1x32xf32> to vector<2x8x32xf32>
    %5 = arith.mulf %0, %4 : vector<2x8x32xf32>
    %cst = arith.constant dense<0.000000e+00> : vector<2x8xf32>
    %6 = vector.multi_reduction <add>, %5, %cst [2] : vector<2x8x32xf32> to vector<2x8xf32>
    %7 = vector.broadcast %2 : f32 to vector<2x8xf32>
    %8 = arith.addf %6, %7 : vector<2x8xf32>
    %9 = math.tanh %8 : vector<2x8xf32>
    %10 = math.exp %9 : vector<2x8xf32>
    %cst_6 = arith.constant dense<0.000000e+00> : vector<2xf32>
    %11 = vector.multi_reduction <add>, %10, %cst_6 [1] : vector<2x8xf32> to vector<2xf32>
    %12 = vector.shape_cast %11 : vector<2xf32> to vector<2x1xf32>
    %13 = vector.broadcast %12 : vector<2x1xf32> to vector<2x8xf32>
    %14 = arith.divf %10, %13 : vector<2x8xf32>
    %cst_7 = arith.constant 1.000000e-10 : f32
    %15 = vector.broadcast %cst_7 : f32 to vector<2x8xf32>
    %16 = arith.addf %14, %15 : vector<2x8xf32>
    %17 = vector.shape_cast %16 : vector<2x8xf32> to vector<2x8x1xf32>
    %18 = vector.broadcast %17 : vector<2x8x1xf32> to vector<2x8x32xf32>
    %19 = arith.mulf %0, %18 : vector<2x8x32xf32>
    %cst_8 = arith.constant dense<0.000000e+00> : vector<2x32xf32>
    %20 = vector.multi_reduction <add>, %19, %cst_8 [1] : vector<2x8x32xf32> to vector<2x32xf32>
    %c0_9 = arith.constant 0 : index
    %c0_10 = arith.constant 0 : index
    %21 = vector.load %arg5[%c0_9, %c0_10] : memref<2x32xf32, #tpu.memory_space<vmem>>, vector<2x32xf32>
    tpu.vector_store %arg5[%c0_9, %c0_10], %20 {strides = array<i32>} : memref<2x32xf32, #tpu.memory_space<vmem>>, vector<2x32xf32>,
    return
  }
  func.func @transform_0(%arg0: i32, %arg1: i32) -> (i32, i32, i32) {
    %c0_i32 = arith.constant 0 : i32
    %c0_i32_0 = arith.constant 0 : i32
    return %arg0, %arg1, %c0_i32 : i32, i32, i32
  }
  func.func @transform_1(%arg0: i32, %arg1: i32) -> (i32, i32) {
    %c0_i32 = arith.constant 0 : i32
    %c0_i32_0 = arith.constant 0 : i32
    %c0_i32_1 = arith.constant 0 : i32
    return %c0_i32, %c0_i32_0 : i32, i32
  }
  func.func @transform_2(%arg0: i32, %arg1: i32) -> (i32, i32) {
    %c0_i32 = arith.constant 0 : i32
    %c0_i32_0 = arith.constant 0 : i32
    %c0_i32_1 = arith.constant 0 : i32
    return %c0_i32, %c0_i32_0 : i32, i32
  }
  func.func @transform_3(%arg0: i32, %arg1: i32) -> (i32, i32) {
    %c0_i32 = arith.constant 0 : i32
    %c0_i32_0 = arith.constant 0 : i32
    return %arg0, %c0_i32 : i32, i32
  }
}

</mosaic_0001>

<bundles_post_ra>
// kernel: tpu_custom_call.1
= control target key start
LH: loop header
LB: loop body
LE: loop exit
PB: predicated region body
PF: predicated region fallthrough
CT: control target
= control target key end

     0   :  { %9 = vsyncpa [#allocation4], 0  ;;  %s248_s0 = inlined_call_operand.hbm [shape: f32[2,8,32], index: 0, kind: input, shape index: {}]   ;;  %s249_s1 = inlined_call_operand.vmem [shape: f32[1,32], index: 1, kind: input, shape index: {}]   ;;  %s250_s2 = inlined_call_operand.<no memory space> [shape: f32[1,1], index: 2, kind: input, shape index: {}]   ;;  %s251_s3 = inlined_call_operand.hbm [shape: f32[2,32], index: 3, kind: output, shape index: {}]  }
   0x1   :  { %10 = vsyncpa [#allocation5], 0  ;;  %s205_s12 = smov [#allocation3]  }
   0x2   :  { %s16_s13 = sshll.u32 %s205_s12, 4  ;;  %s17_s13 = int_to_ptr.vmem [resolvable:$true] %s16_s13 }
   0x3   :  { %s169_s14 = scalar_lea.vmem %s17_s13, 256  ;;  %p174_p1 = scmp.lt.s32.totalorder %s17_s13, %s17_s13 }
   0x4   :  { %p170_p0 = scmp.ne.s32.totalorder %s17_s13, %s169_s14  ;;  %p175_p2 = scmp.lt.s32.totalorder %s169_s14, %s169_s14 }
   0x6   :  { %p176_p3 = por %p175_p2, %p174_p1 }
   0x8   :  { %p177_p4 = pnand %p176_p3, %p170_p0 }
   0xa   :  { %180 = shalt.err (!%p177_p4)
}
   0xb   :  { %s206_s15 = smov 128   ;;  %s207_s16 = smov 8  }
   0xc   :  { %22 = dma.hbm_to_vmem [thread:$0]  %s248_s0, 256, %s17_s13, [#allocation4], %s206_s15, %s206_s15, %s207_s16  }
   0xd   :  { %201 = dma.done.wait [#allocation4], 256  }
   0xe   :  { %202 = vsyncadd [#allocation4], 4294967040  ;;  %v30_v0 = vld [vmem:[#allocation3] sm:$0xff]  ;;  %vm42_vm0 = vcmask 261120   ;;  %v31_v2 = vld [vmem:[#allocation3 + $0x8] sm:$0xff]  ;;  %v49_v7 = vstv %s250_s2  ;;  %v60_v16 = vlaneseq  ;;  %vm70_vm1 = vcmask 1041409  }
   0xf   :  { %v141_v1 = vld [vmem:[%s249_s1] ss:$0 sm:$0xff]  ;;  %vm73_vm2 = vcmask 58368   ;;  %v208_v26 = vmov 0   ;;  %s209_s0 = smov [#allocation6]   ;;  %vm124_vm3 = vcmask 254976  }
  0x10   :  { %v40_v3 = vmul.f32 %v141_v1, %v30_v0  ;;  %v41_v4 = vmul.f32 %v141_v1, %v31_v2  ;;  %v61_v17 = vand.u32 127, %v60_v16  ;;  %v63_v18 = vshrl.u32 %v60_v16, 7  ;;  %148 = vset.pattern.permute.xlu0 %v208_v26  ;;  %147 = vset.pattern.permute.xlu1 %v208_v26  ;;  %s132_s1 = sshll.u32 %s209_s0, 4  ;;  %s133_s1 = int_to_ptr.vmem [resolvable:$true] %s132_s1 }
  0x11   :  { %s181_s2 = scalar_lea.vmem %s133_s1, 32  ;;  %p186_p6 = scmp.lt.s32.totalorder %s133_s1, %s133_s1 }
  0x12   :  { %v43_v5 = vsel %vm42_vm0, %v40_v3, 0.0  ;;  %v46_v6 = vsel %vm42_vm0, %v41_v4, 0.0  ;;  %v64_v19 = vsub.s32 %v61_v17, %v63_v18  ;;  %v80_v27 = vsub.s32 0, %v63_v18  ;;  %p182_p5 = scmp.ne.s32.totalorder %s133_s1, %s181_s2  ;;  %p187_p7 = scmp.lt.s32.totalorder %s181_s2, %s181_s2 }
  0x13   :  { %44 = vadd.xlane.f32.xlu0 %v43_v5  ;;  %v84_v28 = vsub.s32 1, %v63_v18 }
  0x14   :  { %p188_p8 = por %p187_p7, %p186_p6 }
  0x16   :  { %p189_p9 = pnand %p188_p8, %p182_p5 }
  0x17   :  { %47 = vadd.xlane.f32.xlu0 %v46_v6 }
  0x9c   :  { %v45_v8 = vpop.xlane.xlu0 %44 }
  0x9d   :  { %v50_v9 = vadd.f32 %v49_v7, %v45_v8 }
  0x9f   :  { %149 = vtanh.f32 %v50_v9 }
  0xa0   :  { %v48_v10 = vpop.xlane.xlu0 %47 }
  0xa1   :  { %v51_v11 = vadd.f32 %v49_v7, %v48_v10 }
  0xa3   :  { %151 = vtanh.f32 %v51_v11 }
  0xac   :  { %v150_v12 = vpop.eup %149 }
  0xad   :  { %v54_v13 = vmul.f32 1.442695, %v150_v12 }
  0xaf   :  { %153 = vpow2.f32 %v54_v13 }
  0xb0   :  { %v152_v14 = vpop.eup %151 }
  0xb1   :  { %v56_v15 = vmul.f32 1.442695, %v152_v14 }
  0xb3   :  { %155 = vpow2.f32 %v56_v15 }
  0xbc   :  { %v154_v20 = vpop.eup %153 }
  0xbd   :  { %v65_v22 = vrot.slane %v154_v20, %v64_v19 }
  0xc0   :  { %v156_v21 = vpop.eup %155 }
  0xc1   :  { %v69_v23 = vrot.slane %v156_v21, %v64_v19 }
  0xc3   :  { %v71_v24 = vsel %vm70_vm1, %v69_v23, %v65_v22 }
  0xc4   :  { %v74_v25 = vsel %vm73_vm2, %v71_v24, 0.0 }
  0xc5   :  { %75 = vadd.xlane.f32.xlu1 %v74_v25 }
 0x14e   :  { %v76_v29 = vpop.xlane.xlu1 %75 }
 0x14f   :  { %v81_v30 = vrot.slane %v76_v29, %v80_v27  ;;  %v85_v31 = vrot.slane %v76_v29, %v84_v28 }
 0x151   :  { %157 = vrcp.f32 %v81_v30 }
 0x152   :  { %159 = vrcp.f32 %v85_v31 }
 0x15e   :  { %v158_v32 = vpop.eup %157 }
 0x15f   :  { %v160_v33 = vpop.eup %159  ;;  %v89_v34 = vmul.f32 %v158_v32, %v154_v20 }
 0x160   :  { %v91_v35 = vmul.f32 %v160_v33, %v156_v21 }
 0x161   :  { %v92_v36 = vadd.f32 1e-10, %v89_v34 }
 0x162   :  { %v93_v37 = vadd.f32 1e-10, %v91_v35 }
 0x163   :  { %96 = vperm.xlu1 %147, %v92_v36  }
 0x164   :  { %101 = vperm.xlu0 %148, %v93_v37  }
 0x1de   :  { %v97_v38 = vpop.permute.xlu1 %96 }
 0x1df   :  { %v102_v39 = vpop.permute.xlu0 %101  ;;  %v104_v40 = vmul.f32 %v97_v38, %v30_v0 }
 0x1e0   :  { %v105_v41 = vmul.f32 %v102_v39, %v31_v2 }
 0x1e1   :  { %v106_v42 = vsel %vm42_vm0, %v104_v40, 0.0 }
 0x1e2   :  { %v113_v43 = vsel %vm42_vm0, %v105_v41, 0.0  ;;  %v107_v44 = vrot.slane %v106_v42, 4 }
 0x1e3   :  { %v114_v45 = vrot.slane %v113_v43, 4 }
 0x1e4   :  { %v108_v46 = vadd.f32 %v107_v44, %v106_v42 }
 0x1e5   :  { %v115_v47 = vadd.f32 %v114_v45, %v113_v43 }
 0x1e6   :  { %v109_v48 = vrot.slane %v108_v46, 2 }
 0x1e7   :  { %v116_v49 = vrot.slane %v115_v47, 2 }
 0x1e8   :  { %v110_v50 = vadd.f32 %v109_v48, %v108_v46 }
 0x1e9   :  { %v117_v51 = vadd.f32 %v116_v49, %v115_v47 }
 0x1ea   :  { %v111_v52 = vrot.slane %v110_v50, 1 }
 0x1eb   :  { %v118_v53 = vrot.slane %v117_v51, 1 }
 0x1ec   :  { %v112_v54 = vadd.f32 %v111_v52, %v110_v50 }
 0x1ed   :  { %v119_v55 = vadd.f32 %v118_v53, %v117_v51 }
 0x1ef   :  { %v122_v56 = vsel %vm70_vm1, %v119_v55, %v112_v54 }
 0x1f0   :  { %125 = vst.msk [vmem:[#allocation6] sm:$0x3] %vm124_vm3, %v122_v56 }
 0x1f1   :  { %192 = shalt.err (!%p189_p9)
}
 0x1f2   :  { %135 = dma.vmem_to_hbm [thread:$0]  %s133_s1, 32, %s251_s3, [#allocation5]  }
 0x1f3   :  { %203 = dma.done.wait [#allocation5], 32  }
 0x1f4   :  { %204 = vsyncadd [#allocation5], 4294967264 }
 0x1f5   :  { %139 = vsyncpa [#allocation4], 1 }
 0x1f6   :  { %140 = vsyncpa [#allocation5], 1 }

</bundles_post_ra>
